<compile_context>
chip_gen: v5e
topology: v5e:2x2
jax: 0.10.0
libtpu: 0.0.40
codegen_flags: <defaults>
</compile_context>

<pallas_src>
from functools import partial

import jax
import jax.numpy as jnp
from jax.experimental import pallas as pl
from jax.experimental.pallas import tpu as pltpu


def _mlp_kernel(x_ref, w1_ref, b1_ref, w2_ref, b2_ref, o_ref, *,
                nb, n_hid_chunks, hid_chunk):
    # x_ref:  (Nb, Cin, t_hw)   lane-dense activation slab
    # w1_ref: (Chid, Cin)       fc1 weight (conv orientation)
    # b1_ref: (Chid, 1)         f32
    # w2_ref: (Cout, Chid)      fc2 weight
    # b2_ref: (Cout, 1)         f32
    # o_ref:  (Nb, Cout, t_hw)
    for b in range(nb):                       # static unroll over merged batch
        x = x_ref[b]                          # (Cin, t_hw)
        acc = None
        for c in range(n_hid_chunks):         # static unroll over hidden chunks
            lo = c * hid_chunk
            hi = lo + hid_chunk
            h = jnp.dot(w1_ref[lo:hi, :], x,
                        preferred_element_type=jnp.float32) + b1_ref[lo:hi, :]
            h = jnp.clip(h, 0.0, 6.0)         # ReLU6 (f32, VPU)
            # dropout(p=0.0) -> identity (no-op)
            p = jnp.dot(w2_ref[:, lo:hi], h.astype(w2_ref.dtype),
                        preferred_element_type=jnp.float32)
            acc = p if acc is None else acc + p
        y = acc + b2_ref[...]
        # dropout(p=0.0) -> identity (no-op)
        o_ref[b] = y.astype(o_ref.dtype)


def _choose_hw_tile(hw, cap, n_batch):
    """Pick (t_hw, hw_pad) for the lane (spatial) axis.

    Both are multiples of 128 (lane-dense, unmasked stores).  HW is padded up
    to a multiple of the tile instead of forcing the tile down to a divisor,
    so awkward HW factors never collapse the tile to 128.
    """
    cap = max(128, (cap // 128) * 128)
    hw128 = pl.cdiv(hw, 128) * 128            # lane-dense 128-multiple
    n_tiles = pl.cdiv(hw128, cap)
    # v7x megacore: with a single batch element make sure there are >= 2 HW
    # tiles so the ("parallel","parallel") grid spans both TensorCores.
    if n_batch == 1 and n_tiles < 2 and hw128 >= 256:
        n_tiles = 2
    t = pl.cdiv(pl.cdiv(hw128, n_tiles), 128) * 128
    hw_pad = pl.cdiv(hw128, t) * t
    return t, hw_pad


def _choose_batch_block(n, per_sample_slab_bytes, target_bytes=1 << 20):
    """Largest divisor of n (capped at 8) whose merged slab stays ~<=1 MiB."""
    nb = 1
    for cand in range(1, min(n, 8) + 1):
        if n % cand == 0 and cand * per_sample_slab_bytes <= target_bytes:
            nb = cand
    return nb


def mlp_pallas(x_nchw, w1, b1, w2, b2, *, tile_hw=1024,
               compute_dtype=jnp.bfloat16):
    """Fused 1x1-conv MLP (fc1 -> ReLU6 -> fc2), dropout(p=0) folded away.

    x_nchw: (N, Cin, H, W)
    w1: (Chid, Cin)   -- PyTorch fc1.weight[..., 0, 0]
    b1: (Chid,)
    w2: (Cout, Chid)  -- PyTorch fc2.weight[..., 0, 0]
    b2: (Cout,)
    compute_dtype: HBM-facing dtype for x/w (default bf16 on all TPU gens;
                   MXU accumulation stays f32).  Pass None for exact f32.
    """
    N, Cin, H, W = x_nchw.shape
    Chid = w1.shape[0]
    Cout = w2.shape[0]
    HW = H * W
    out_dtype = x_nchw.dtype

    # Free view: no transpose, channels stay on sublanes, tokens on lanes.
    x = x_nchw.reshape(N, Cin, HW)
    if compute_dtype is not None:
        x = x.astype(compute_dtype)
        w1 = w1.astype(compute_dtype)
        w2 = w2.astype(compute_dtype)

    t_hw, hw_pad = _choose_hw_tile(HW, tile_hw, N)
    if hw_pad != HW:
        x = jnp.pad(x, ((0, 0), (0, 0), (0, hw_pad - HW)))

    # In-kernel hidden (Chid) chunking: bound the live (chunk, t_hw) f32 temp
    # (~<=4 MiB) so large hidden widths fit v7x's 64 MiB VMEM.  Chunks are
    # multiples of 256 (MXU-friendly); zero-padded hidden rows/cols contribute
    # exactly 0 through relu6 and the zero w2 columns.
    hid_budget = 4 * 2**20
    max_chunk = max(256, ((hid_budget // (t_hw * 4)) // 256) * 256)
    if Chid <= max_chunk:
        hid_chunk, n_hid_chunks = Chid, 1
    else:
        hid_chunk = max_chunk
        n_hid_chunks = pl.cdiv(Chid, hid_chunk)
        chid_pad = n_hid_chunks * hid_chunk
        w1 = jnp.pad(w1, ((0, chid_pad - Chid), (0, 0)))
        b1 = jnp.pad(b1, ((0, chid_pad - Chid),))
        w2 = jnp.pad(w2, ((0, 0), (0, chid_pad - Chid)))
        Chid = chid_pad

    in_itemsize = jnp.dtype(x.dtype).itemsize
    w_itemsize = jnp.dtype(w1.dtype).itemsize
    out_itemsize = jnp.dtype(out_dtype).itemsize

    # Merge batch elements per grid step for small problems (fewer, bigger DMAs).
    Nb = _choose_batch_block(N, (Cin * in_itemsize + Cout * out_itemsize) * t_hw)

    # Biases as (C, 1) f32 columns -> broadcast along lanes inside the kernel.
    b1_2d = b1.reshape(Chid, 1).astype(jnp.float32)
    b2_2d = b2.reshape(Cout, 1).astype(jnp.float32)

    flops = 2 * N * hw_pad * (Cin * Chid + Chid * Cout)
    bytes_accessed = (N * hw_pad * Cin * in_itemsize
                      + N * hw_pad * Cout * out_itemsize
                      + (Chid * Cin + Cout * Chid) * w_itemsize
                      + (Chid + Cout) * 4)

    # VMEM budget: double-buffered x/out slabs + resident weights + f32 temps.
    weight_bytes = (Chid * Cin + Cout * Chid) * w_itemsize + (Chid + Cout) * 4
    slab_bytes = Nb * (Cin * in_itemsize + Cout * out_itemsize) * t_hw
    temp_bytes = (hid_chunk + Cout) * t_hw * 4
    vmem_needed = 2 * slab_bytes + 2 * weight_bytes + Nb * temp_bytes
    # Cap below v7x's 64 MiB physical VMEM; raise above all default scoped limits.
    vmem_limit = int(min(48 * 2**20, max(2 * vmem_needed, 16 * 2**20)))

    grid = (N // Nb, hw_pad // t_hw)
    kernel = partial(_mlp_kernel, nb=Nb, n_hid_chunks=n_hid_chunks,
                     hid_chunk=hid_chunk)

    def build(single_buffer_weights):
        def wspec(shape):
            imap = lambda n, j: (0,) * len(shape)
            if single_buffer_weights:
                # Constant across the grid -> no point double-buffering.
                return pl.BlockSpec(shape, imap, pipeline_mode=pl.Buffered(1))
            return pl.BlockSpec(shape, imap)

        return pl.pallas_call(
            kernel,
            out_shape=jax.ShapeDtypeStruct((N, Cout, hw_pad), out_dtype),
            grid_spec=pltpu.PrefetchScalarGridSpec(
                num_scalar_prefetch=0,
                grid=grid,
                in_specs=[
                    pl.BlockSpec((Nb, Cin, t_hw), lambda n, j: (n, 0, j)),  # x
                    wspec((Chid, Cin)),                                      # fc1 W
                    wspec((Chid, 1)),                                        # fc1 b
                    wspec((Cout, Chid)),                                     # fc2 W
                    wspec((Cout, 1)),                                        # fc2 b
                ],
                out_specs=pl.BlockSpec((Nb, Cout, t_hw), lambda n, j: (n, 0, j)),
            ),
            compiler_params=pltpu.CompilerParams(
                dimension_semantics=("parallel", "parallel"),
                vmem_limit_bytes=vmem_limit),
            cost_estimate=pl.CostEstimate(
                flops=flops, transcendentals=0, bytes_accessed=bytes_accessed),
        )

    try:
        out = build(True)(x, w1, b1_2d, w2, b2_2d)
    except Exception:
        # pipeline_mode=pl.Buffered(1) (single-buffered resident weights) is not
        # supported on every JAX version; fall back to default double-buffering.
        out = build(False)(x, w1, b1_2d, w2, b2_2d)

    if hw_pad != HW:
        out = out[:, :, :HW]
    return out.reshape(N, Cout, H, W)          # free view back to NCHW


def mlp_reference(x_nchw, w1, b1, w2, b2):
    """Pure-JAX reference matching the PyTorch forward (1x1 conv semantics)."""
    h = jnp.einsum("oi,nihw->nohw", w1, x_nchw) + b1[None, :, None, None]
    h = jnp.clip(h, 0.0, 6.0)
    y = jnp.einsum("oi,nihw->nohw", w2, h) + b2[None, :, None, None]
    return y


if __name__ == "__main__":
    key = jax.random.PRNGKey(0)
    k_x, k_w1, k_b1, k_w2, k_b2 = jax.random.split(key, 5)

    # Small shapes consistent with the module: batch=2, in_features=4,
    # hidden_features=32, out_features=4 (defaults to in), spatial=16.
    N, Cin, H, W = 2, 4, 16, 16
    Chid, Cout = 32, 4

    x = jax.random.normal(k_x, (N, Cin, H, W), dtype=jnp.float32)
    w1 = jax.random.normal(k_w1, (Chid, Cin), dtype=jnp.float32) * 0.1
    b1 = jax.random.normal(k_b1, (Chid,), dtype=jnp.float32) * 0.1
    w2 = jax.random.normal(k_w2, (Cout, Chid), dtype=jnp.float32) * 0.1
    b2 = jax.random.normal(k_b2, (Cout,), dtype=jnp.float32) * 0.1

    ref = mlp_reference(x, w1, b1, w2, b2)

    # Exact f32 path: tight tolerance.
    out_f32 = mlp_pallas(x, w1, b1, w2, b2, compute_dtype=None)
    jax.block_until_ready(out_f32)
    assert out_f32.shape == (N, Cout, H, W), out_f32.shape
    assert jnp.allclose(out_f32, ref, atol=1e-5, rtol=1e-5), "f32 mismatch"

    # Default bf16 HBM path (f32 MXU accumulation): relaxed tolerance.
    out_bf16 = mlp_pallas(x, w1, b1, w2, b2)
    jax.block_until_ready(out_bf16)
    assert out_bf16.shape == (N, Cout, H, W), out_bf16.shape
    assert jnp.allclose(out_bf16, ref, atol=2e-2, rtol=2e-2), "bf16 mismatch"

    print("KERNEL_OK")
</pallas_src>

<mosaic_0001>
module attributes {stable_mosaic.version = 11 : i64} {
  func.func @_mlp_kernel(%arg0: i32, %arg1: i32, %arg2: memref<2x4x256xf32, #tpu.memory_space<vmem>>, %arg3: memref<32x4xf32, #tpu.memory_space<vmem>>, %arg4: memref<32x1xf32, #tpu.memory_space<vmem>>, %arg5: memref<4x32xf32, #tpu.memory_space<vmem>>, %arg6: memref<4x1xf32, #tpu.memory_space<vmem>>, %arg7: memref<2x4x256xf32, #tpu.memory_space<vmem>>) attributes {dimension_semantics = [#tpu.dimension_semantics<parallel>, #tpu.dimension_semantics<parallel>], iteration_bounds = array<i64: 1, 1>, scalar_prefetch = 0 : i64, scratch_operands = 0 : i64, tpu.core_type = #tpu.core_type<tc>, window_params = [{transform_indices = @transform_0, window_bounds = array<i64: 2, 4, 256>}, {pipeline_mode = #tpu.pipeline_mode<synchronous>, transform_indices = @transform_1, window_bounds = array<i64: 32, 4>}, {pipeline_mode = #tpu.pipeline_mode<synchronous>, transform_indices = @transform_2, window_bounds = array<i64: 32, 1>}, {pipeline_mode = #tpu.pipeline_mode<synchronous>, transform_indices = @transform_3, window_bounds = array<i64: 4, 32>}, {pipeline_mode = #tpu.pipeline_mode<synchronous>, transform_indices = @transform_4, window_bounds = array<i64: 4, 1>}, {transform_indices = @transform_5, window_bounds = array<i64: 2, 4, 256>}]} {
    %c0 = arith.constant 0 : index
    %c0_0 = arith.constant 0 : index
    %c0_1 = arith.constant 0 : index
    %0 = vector.load %arg2[%c0, %c0_0, %c0_1] : memref<2x4x256xf32, #tpu.memory_space<vmem>>, vector<1x4x256xf32>
    %1 = vector.shape_cast %0 : vector<1x4x256xf32> to vector<4x256xf32>
    %c0_2 = arith.constant 0 : index
    %c0_3 = arith.constant 0 : index
    %2 = vector.load %arg3[%c0_2, %c0_3] : memref<32x4xf32, #tpu.memory_space<vmem>>, vector<32x4xf32>
    %cst = arith.constant dense<0.000000e+00> : vector<32x256xf32>
    %3 = tpu.matmul %2, %1, %cst {dimension_numbers = #tpu.dot_dimension_numbers<[1], [0], [0], [1], [0, 0, 1, 1], [], []>} : vector<32x4xf32>, vector<4x256xf32>, vector<32x256xf32> -> vector<32x256xf32>
    %c0_4 = arith.constant 0 : index
    %c0_5 = arith.constant 0 : index
    %4 = vector.load %arg4[%c0_4, %c0_5] : memref<32x1xf32, #tpu.memory_space<vmem>>, vector<32x1xf32>
    %5 = vector.broadcast %4 : vector<32x1xf32> to vector<32x256xf32>
    %6 = arith.addf %3, %5 : vector<32x256xf32>
    %cst_6 = arith.constant 0.000000e+00 : f32
    %cst_7 = arith.constant 6.000000e+00 : f32
    %7 = vector.broadcast %cst_6 : f32 to vector<32x256xf32>
    %8 = arith.maximumf %7, %6 : vector<32x256xf32>
    %9 = vector.broadcast %cst_7 : f32 to vector<32x256xf32>
    %10 = arith.minimumf %9, %8 : vector<32x256xf32>
    %c0_8 = arith.constant 0 : index
    %c0_9 = arith.constant 0 : index
    %11 = vector.load %arg5[%c0_8, %c0_9] : memref<4x32xf32, #tpu.memory_space<vmem>>, vector<4x32xf32>
    %cst_10 = arith.constant dense<0.000000e+00> : vector<4x256xf32>
    %12 = tpu.matmul %11, %10, %cst_10 {dimension_numbers = #tpu.dot_dimension_numbers<[1], [0], [0], [1], [0, 0, 1, 1], [], []>} : vector<4x32xf32>, vector<32x256xf32>, vector<4x256xf32> -> vector<4x256xf32>
    %c0_11 = arith.constant 0 : index
    %c0_12 = arith.constant 0 : index
    %13 = vector.load %arg6[%c0_11, %c0_12] : memref<4x1xf32, #tpu.memory_space<vmem>>, vector<4x1xf32>
    %14 = vector.broadcast %13 : vector<4x1xf32> to vector<4x256xf32>
    %15 = arith.addf %12, %14 : vector<4x256xf32>
    %c0_13 = arith.constant 0 : index
    %c0_14 = arith.constant 0 : index
    %c0_15 = arith.constant 0 : index
    %16 = vector.load %arg7[%c0_13, %c0_14, %c0_15] : memref<2x4x256xf32, #tpu.memory_space<vmem>>, vector<1x4x256xf32>
    %17 = vector.shape_cast %16 : vector<1x4x256xf32> to vector<4x256xf32>
    %18 = vector.shape_cast %15 : vector<4x256xf32> to vector<1x4x256xf32>
    tpu.vector_store %arg7[%c0_13, %c0_14, %c0_15], %18 {strides = array<i32>} : memref<2x4x256xf32, #tpu.memory_space<vmem>>, vector<1x4x256xf32>,
    %c1 = arith.constant 1 : index
    %c0_16 = arith.constant 0 : index
    %c0_17 = arith.constant 0 : index
    %19 = vector.load %arg2[%c1, %c0_16, %c0_17] : memref<2x4x256xf32, #tpu.memory_space<vmem>>, vector<1x4x256xf32>
    %20 = vector.shape_cast %19 : vector<1x4x256xf32> to vector<4x256xf32>
    %c0_18 = arith.constant 0 : index
    %c0_19 = arith.constant 0 : index
    %21 = vector.load %arg3[%c0_18, %c0_19] : memref<32x4xf32, #tpu.memory_space<vmem>>, vector<32x4xf32>
    %cst_20 = arith.constant dense<0.000000e+00> : vector<32x256xf32>
    %22 = tpu.matmul %21, %20, %cst_20 {dimension_numbers = #tpu.dot_dimension_numbers<[1], [0], [0], [1], [0, 0, 1, 1], [], []>} : vector<32x4xf32>, vector<4x256xf32>, vector<32x256xf32> -> vector<32x256xf32>
    %c0_21 = arith.constant 0 : index
    %c0_22 = arith.constant 0 : index
    %23 = vector.load %arg4[%c0_21, %c0_22] : memref<32x1xf32, #tpu.memory_space<vmem>>, vector<32x1xf32>
    %24 = vector.broadcast %23 : vector<32x1xf32> to vector<32x256xf32>
    %25 = arith.addf %22, %24 : vector<32x256xf32>
    %cst_23 = arith.constant 0.000000e+00 : f32
    %cst_24 = arith.constant 6.000000e+00 : f32
    %26 = vector.broadcast %cst_23 : f32 to vector<32x256xf32>
    %27 = arith.maximumf %26, %25 : vector<32x256xf32>
    %28 = vector.broadcast %cst_24 : f32 to vector<32x256xf32>
    %29 = arith.minimumf %28, %27 : vector<32x256xf32>
    %c0_25 = arith.constant 0 : index
    %c0_26 = arith.constant 0 : index
    %30 = vector.load %arg5[%c0_25, %c0_26] : memref<4x32xf32, #tpu.memory_space<vmem>>, vector<4x32xf32>
    %cst_27 = arith.constant dense<0.000000e+00> : vector<4x256xf32>
    %31 = tpu.matmul %30, %29, %cst_27 {dimension_numbers = #tpu.dot_dimension_numbers<[1], [0], [0], [1], [0, 0, 1, 1], [], []>} : vector<4x32xf32>, vector<32x256xf32>, vector<4x256xf32> -> vector<4x256xf32>
    %c0_28 = arith.constant 0 : index
    %c0_29 = arith.constant 0 : index
    %32 = vector.load %arg6[%c0_28, %c0_29] : memref<4x1xf32, #tpu.memory_space<vmem>>, vector<4x1xf32>
    %33 = vector.broadcast %32 : vector<4x1xf32> to vector<4x256xf32>
    %34 = arith.addf %31, %33 : vector<4x256xf32>
    %c1_30 = arith.constant 1 : index
    %c0_31 = arith.constant 0 : index
    %c0_32 = arith.constant 0 : index
    %35 = vector.load %arg7[%c1_30, %c0_31, %c0_32] : memref<2x4x256xf32, #tpu.memory_space<vmem>>, vector<1x4x256xf32>
    %36 = vector.shape_cast %35 : vector<1x4x256xf32> to vector<4x256xf32>
    %37 = vector.shape_cast %34 : vector<4x256xf32> to vector<1x4x256xf32>
    tpu.vector_store %arg7[%c1_30, %c0_31, %c0_32], %37 {strides = array<i32>} : memref<2x4x256xf32, #tpu.memory_space<vmem>>, vector<1x4x256xf32>,
    return
  }
  func.func @transform_0(%arg0: i32, %arg1: i32) -> (i32, i32, i32) {
    %c0_i32 = arith.constant 0 : i32
    %c0_i32_0 = arith.constant 0 : i32
    return %arg0, %c0_i32, %arg1 : i32, i32, i32
  }
  func.func @transform_1(%arg0: i32, %arg1: i32) -> (i32, i32) {
    %c0_i32 = arith.constant 0 : i32
    %c0_i32_0 = arith.constant 0 : i32
    %c0_i32_1 = arith.constant 0 : i32
    return %c0_i32, %c0_i32_0 : i32, i32
  }
  func.func @transform_2(%arg0: i32, %arg1: i32) -> (i32, i32) {
    %c0_i32 = arith.constant 0 : i32
    %c0_i32_0 = arith.constant 0 : i32
    %c0_i32_1 = arith.constant 0 : i32
    return %c0_i32, %c0_i32_0 : i32, i32
  }
  func.func @transform_3(%arg0: i32, %arg1: i32) -> (i32, i32) {
    %c0_i32 = arith.constant 0 : i32
    %c0_i32_0 = arith.constant 0 : i32
    %c0_i32_1 = arith.constant 0 : i32
    return %c0_i32, %c0_i32_0 : i32, i32
  }
  func.func @transform_4(%arg0: i32, %arg1: i32) -> (i32, i32) {
    %c0_i32 = arith.constant 0 : i32
    %c0_i32_0 = arith.constant 0 : i32
    %c0_i32_1 = arith.constant 0 : i32
    return %c0_i32, %c0_i32_0 : i32, i32
  }
  func.func @transform_5(%arg0: i32, %arg1: i32) -> (i32, i32, i32) {
    %c0_i32 = arith.constant 0 : i32
    %c0_i32_0 = arith.constant 0 : i32
    return %arg0, %c0_i32, %arg1 : i32, i32, i32
  }
}

module attributes {stable_mosaic.version = 11 : i64} {
  func.func @_mlp_kernel(%arg0: i32, %arg1: i32, %arg2: memref<2x4x256xf32, #tpu.memory_space<vmem>>, %arg3: memref<32x4xf32, #tpu.memory_space<vmem>>, %arg4: memref<32x1xf32, #tpu.memory_space<vmem>>, %arg5: memref<4x32xf32, #tpu.memory_space<vmem>>, %arg6: memref<4x1xf32, #tpu.memory_space<vmem>>, %arg7: memref<2x4x256xf32, #tpu.memory_space<vmem>>) attributes {dimension_semantics = [#tpu.dimension_semantics<parallel>, #tpu.dimension_semantics<parallel>], iteration_bounds = array<i64: 1, 1>, scalar_prefetch = 0 : i64, scratch_operands = 0 : i64, tpu.core_type = #tpu.core_type<tc>, window_params = [{transform_indices = @transform_0, window_bounds = array<i64: 2, 4, 256>}, {pipeline_mode = #tpu.pipeline_mode<synchronous>, transform_indices = @transform_1, window_bounds = array<i64: 32, 4>}, {pipeline_mode = #tpu.pipeline_mode<synchronous>, transform_indices = @transform_2, window_bounds = array<i64: 32, 1>}, {pipeline_mode = #tpu.pipeline_mode<synchronous>, transform_indices = @transform_3, window_bounds = array<i64: 4, 32>}, {pipeline_mode = #tpu.pipeline_mode<synchronous>, transform_indices = @transform_4, window_bounds = array<i64: 4, 1>}, {transform_indices = @transform_5, window_bounds = array<i64: 2, 4, 256>}]} {
    %c0 = arith.constant 0 : index
    %c0_0 = arith.constant 0 : index
    %c0_1 = arith.constant 0 : index
    %0 = vector.load %arg2[%c0, %c0_0, %c0_1] : memref<2x4x256xf32, #tpu.memory_space<vmem>>, vector<1x4x256xf32>
    %1 = vector.shape_cast %0 : vector<1x4x256xf32> to vector<4x256xf32>
    %c0_2 = arith.constant 0 : index
    %c0_3 = arith.constant 0 : index
    %2 = vector.load %arg3[%c0_2, %c0_3] : memref<32x4xf32, #tpu.memory_space<vmem>>, vector<32x4xf32>
    %cst = arith.constant dense<0.000000e+00> : vector<32x256xf32>
    %3 = tpu.matmul %2, %1, %cst {dimension_numbers = #tpu.dot_dimension_numbers<[1], [0], [0], [1], [0, 0, 1, 1], [], []>} : vector<32x4xf32>, vector<4x256xf32>, vector<32x256xf32> -> vector<32x256xf32>
    %c0_4 = arith.constant 0 : index
    %c0_5 = arith.constant 0 : index
    %4 = vector.load %arg4[%c0_4, %c0_5] : memref<32x1xf32, #tpu.memory_space<vmem>>, vector<32x1xf32>
    %5 = vector.broadcast %4 : vector<32x1xf32> to vector<32x256xf32>
    %6 = arith.addf %3, %5 : vector<32x256xf32>
    %cst_6 = arith.constant 0.000000e+00 : f32
    %cst_7 = arith.constant 6.000000e+00 : f32
    %7 = vector.broadcast %cst_6 : f32 to vector<32x256xf32>
    %8 = arith.maximumf %7, %6 : vector<32x256xf32>
    %9 = vector.broadcast %cst_7 : f32 to vector<32x256xf32>
    %10 = arith.minimumf %9, %8 : vector<32x256xf32>
    %c0_8 = arith.constant 0 : index
    %c0_9 = arith.constant 0 : index
    %11 = vector.load %arg5[%c0_8, %c0_9] : memref<4x32xf32, #tpu.memory_space<vmem>>, vector<4x32xf32>
    %cst_10 = arith.constant dense<0.000000e+00> : vector<4x256xf32>
    %12 = tpu.matmul %11, %10, %cst_10 {dimension_numbers = #tpu.dot_dimension_numbers<[1], [0], [0], [1], [0, 0, 1, 1], [], []>} : vector<4x32xf32>, vector<32x256xf32>, vector<4x256xf32> -> vector<4x256xf32>
    %c0_11 = arith.constant 0 : index
    %c0_12 = arith.constant 0 : index
    %13 = vector.load %arg6[%c0_11, %c0_12] : memref<4x1xf32, #tpu.memory_space<vmem>>, vector<4x1xf32>
    %14 = vector.broadcast %13 : vector<4x1xf32> to vector<4x256xf32>
    %15 = arith.addf %12, %14 : vector<4x256xf32>
    %c0_13 = arith.constant 0 : index
    %c0_14 = arith.constant 0 : index
    %c0_15 = arith.constant 0 : index
    %16 = vector.load %arg7[%c0_13, %c0_14, %c0_15] : memref<2x4x256xf32, #tpu.memory_space<vmem>>, vector<1x4x256xf32>
    %17 = vector.shape_cast %16 : vector<1x4x256xf32> to vector<4x256xf32>
    %18 = vector.shape_cast %15 : vector<4x256xf32> to vector<1x4x256xf32>
    tpu.vector_store %arg7[%c0_13, %c0_14, %c0_15], %18 {strides = array<i32>} : memref<2x4x256xf32, #tpu.memory_space<vmem>>, vector<1x4x256xf32>,
    %c1 = arith.constant 1 : index
    %c0_16 = arith.constant 0 : index
    %c0_17 = arith.constant 0 : index
    %19 = vector.load %arg2[%c1, %c0_16, %c0_17] : memref<2x4x256xf32, #tpu.memory_space<vmem>>, vector<1x4x256xf32>
    %20 = vector.shape_cast %19 : vector<1x4x256xf32> to vector<4x256xf32>
    %c0_18 = arith.constant 0 : index
    %c0_19 = arith.constant 0 : index
    %21 = vector.load %arg3[%c0_18, %c0_19] : memref<32x4xf32, #tpu.memory_space<vmem>>, vector<32x4xf32>
    %cst_20 = arith.constant dense<0.000000e+00> : vector<32x256xf32>
    %22 = tpu.matmul %21, %20, %cst_20 {dimension_numbers = #tpu.dot_dimension_numbers<[1], [0], [0], [1], [0, 0, 1, 1], [], []>} : vector<32x4xf32>, vector<4x256xf32>, vector<32x256xf32> -> vector<32x256xf32>
    %c0_21 = arith.constant 0 : index
    %c0_22 = arith.constant 0 : index
    %23 = vector.load %arg4[%c0_21, %c0_22] : memref<32x1xf32, #tpu.memory_space<vmem>>, vector<32x1xf32>
    %24 = vector.broadcast %23 : vector<32x1xf32> to vector<32x256xf32>
    %25 = arith.addf %22, %24 : vector<32x256xf32>
    %cst_23 = arith.constant 0.000000e+00 : f32
    %cst_24 = arith.constant 6.000000e+00 : f32
    %26 = vector.broadcast %cst_23 : f32 to vector<32x256xf32>
    %27 = arith.maximumf %26, %25 : vector<32x256xf32>
    %28 = vector.broadcast %cst_24 : f32 to vector<32x256xf32>
    %29 = arith.minimumf %28, %27 : vector<32x256xf32>
    %c0_25 = arith.constant 0 : index
    %c0_26 = arith.constant 0 : index
    %30 = vector.load %arg5[%c0_25, %c0_26] : memref<4x32xf32, #tpu.memory_space<vmem>>, vector<4x32xf32>
    %cst_27 = arith.constant dense<0.000000e+00> : vector<4x256xf32>
    %31 = tpu.matmul %30, %29, %cst_27 {dimension_numbers = #tpu.dot_dimension_numbers<[1], [0], [0], [1], [0, 0, 1, 1], [], []>} : vector<4x32xf32>, vector<32x256xf32>, vector<4x256xf32> -> vector<4x256xf32>
    %c0_28 = arith.constant 0 : index
    %c0_29 = arith.constant 0 : index
    %32 = vector.load %arg6[%c0_28, %c0_29] : memref<4x1xf32, #tpu.memory_space<vmem>>, vector<4x1xf32>
    %33 = vector.broadcast %32 : vector<4x1xf32> to vector<4x256xf32>
    %34 = arith.addf %31, %33 : vector<4x256xf32>
    %c1_30 = arith.constant 1 : index
    %c0_31 = arith.constant 0 : index
    %c0_32 = arith.constant 0 : index
    %35 = vector.load %arg7[%c1_30, %c0_31, %c0_32] : memref<2x4x256xf32, #tpu.memory_space<vmem>>, vector<1x4x256xf32>
    %36 = vector.shape_cast %35 : vector<1x4x256xf32> to vector<4x256xf32>
    %37 = vector.shape_cast %34 : vector<4x256xf32> to vector<1x4x256xf32>
    tpu.vector_store %arg7[%c1_30, %c0_31, %c0_32], %37 {strides = array<i32>} : memref<2x4x256xf32, #tpu.memory_space<vmem>>, vector<1x4x256xf32>,
    return
  }
  func.func @transform_0(%arg0: i32, %arg1: i32) -> (i32, i32, i32) {
    %c0_i32 = arith.constant 0 : i32
    %c0_i32_0 = arith.constant 0 : i32
    return %arg0, %c0_i32, %arg1 : i32, i32, i32
  }
  func.func @transform_1(%arg0: i32, %arg1: i32) -> (i32, i32) {
    %c0_i32 = arith.constant 0 : i32
    %c0_i32_0 = arith.constant 0 : i32
    %c0_i32_1 = arith.constant 0 : i32
    return %c0_i32, %c0_i32_0 : i32, i32
  }
  func.func @transform_2(%arg0: i32, %arg1: i32) -> (i32, i32) {
    %c0_i32 = arith.constant 0 : i32
    %c0_i32_0 = arith.constant 0 : i32
    %c0_i32_1 = arith.constant 0 : i32
    return %c0_i32, %c0_i32_0 : i32, i32
  }
  func.func @transform_3(%arg0: i32, %arg1: i32) -> (i32, i32) {
    %c0_i32 = arith.constant 0 : i32
    %c0_i32_0 = arith.constant 0 : i32
    %c0_i32_1 = arith.constant 0 : i32
    return %c0_i32, %c0_i32_0 : i32, i32
  }
  func.func @transform_4(%arg0: i32, %arg1: i32) -> (i32, i32) {
    %c0_i32 = arith.constant 0 : i32
    %c0_i32_0 = arith.constant 0 : i32
    %c0_i32_1 = arith.constant 0 : i32
    return %c0_i32, %c0_i32_0 : i32, i32
  }
  func.func @transform_5(%arg0: i32, %arg1: i32) -> (i32, i32, i32) {
    %c0_i32 = arith.constant 0 : i32
    %c0_i32_0 = arith.constant 0 : i32
    return %arg0, %c0_i32, %arg1 : i32, i32, i32
  }
}

</mosaic_0001>

<bundles_post_ra>
// kernel: tpu_custom_call.1
= control target key start
LH: loop header
LB: loop body
LE: loop exit
PB: predicated region body
PF: predicated region fallthrough
CT: control target
= control target key end

     0   :  { %v460_v1 = vmov 0   ;;  %s589_s0 = inlined_call_operand.vmem [shape: f32[2,4,256], index: 0, kind: input, shape index: {}]   ;;  %s590_s1 = inlined_call_operand.vmem [shape: f32[32,4], index: 1, kind: input, shape index: {}]   ;;  %s591_s2 = inlined_call_operand.vmem [shape: f32[32,1], index: 2, kind: input, shape index: {}]   ;;  %s592_s3 = inlined_call_operand.vmem [shape: f32[4,32], index: 3, kind: input, shape index: {}]   ;;  %s593_s4 = inlined_call_operand.vmem [shape: f32[4,1], index: 4, kind: input, shape index: {}]   ;;  %s594_s5 = inlined_call_operand.hbm [shape: f32[2,4,256], index: 5, kind: output, shape index: {}]  }
   0x1   :  { %v21_v0 = vld [vmem:[%s589_s0] sm:$0xff]  ;;  %432 = vset.pattern.permute.xlu1 %v460_v1  ;;  %v27_v2 = vld [vmem:[%s591_s2 + $0x8] sm:$0xff]  ;;  %431 = vset.pattern.permute.xlu0 %v460_v1  ;;  %v29_v3 = vld [vmem:[%s591_s2 + $0x18] sm:$0xff] }
   0x2   :  { %51 = vst [vmem:[#allocation1] ss:$2 sm:$0xff] %v21_v0  ;;  %37 = vperm.xlu1 %432, %v27_v2   ;;  %47 = vperm.xlu0 %431, %v29_v3  }
   0x3   :  { %433 = vset.pattern.permute.xlu2 %v460_v1 }
   0x4   :  { %10 = vsyncpa [#allocation3], 0  ;;  %230 = vperm.xlu2 %433, %v29_v3   ;;  %vm67_vm0 = vcmask 1043456   ;;  %v414_v4 = vld [vmem:[%s589_s0 + $0x8] sm:$0xff]  ;;  %v509_v5 = vld [vmem:[%s590_s1] sm:$0xff]  ;;  %vm54_vm1 = vcmask 31744  }
   0x5   :  { %v26_v6 = vld [vmem:[%s591_s2] sm:$0xff]  ;;  %v28_v7 = vld [vmem:[%s591_s2 + $0x10] sm:$0xff]  ;;  %v526_v10 = vld [vmem:[%s590_s1 + $0x8] sm:$0xff]  ;;  %vm153_vm2 = vcmask 261120   ;;  %s461_s17 = smov [#allocation2]   ;;  %s390_s21 = sshll.u32 %s594_s5, 4  ;;  %s391_s21 = int_to_ptr.hbm [resolvable:$true] %s390_s21 }
   0x6   :  { %v535_v11 = vld [vmem:[%s590_s1 + $0x10] sm:$0xff]  ;;  %v328_v12 = vld [vmem:[%s593_s4] sm:$0xf]  ;;  %v547_v13 = vld [vmem:[%s590_s1 + $0x18] sm:$0xff]  ;;  %s388_s18 = sshll.u32 %s461_s17, 4  ;;  %s463_s22 = smov 8   ;;  %s389_s18 = int_to_ptr.vmem [resolvable:$true] %s388_s18 }
   0x7   :  { %v146_v50 = vld [vmem:[%s592_s3] sm:$0xf] }
   0x8   :  { %v147_v53 = vld [vmem:[%s593_s4] sm:$0xf] }
   0x9   :  { %v52_v8 = vld.sshfl [vmem:[#allocation1] sm:$0xff pattern:$0x75316420]  ;;  %v53_v9 = vld.sshfl [vmem:[#allocation1 + $0x8] sm:$0xff pattern:$0x75316420] }
   0xa   :  { %402 = vmatpush.msk.msra.mxu0 %vm67_vm0, %v52_v8  ;;  %407 = vmatpush.msk.msra.mxu1 %vm67_vm0, %v53_v9  ;;  %234 = vst [vmem:[#allocation1] ss:$2 sm:$0xff] %v414_v4 }
   0xb   :  { %403 = vmatmul.msk.f32.vlgmr.msra.gmra.mxu0 %vm54_vm1, %v509_v5  ;;  %408 = vmatmul.msk.f32.vlgmr.msra.gmra.mxu1 %vm54_vm1, %v509_v5 }
   0xc   :  { %32 = vperm.xlu1 %432, %v26_v6   ;;  %42 = vperm.xlu0 %431, %v28_v7  }
   0xd   :  { %225 = vperm.xlu2 %433, %v28_v7  }
  0x11   :  { %v235_v51 = vld.sshfl [vmem:[#allocation1] sm:$0xff pattern:$0x75316420]  ;;  %v236_v52 = vld.sshfl [vmem:[#allocation1 + $0x8] sm:$0xff pattern:$0x75316420] }
  0x13   :  { %404 = vmatmul.msk.f32.gmra.mxu0 %vm54_vm1, %v526_v10  ;;  %409 = vmatmul.msk.f32.gmra.mxu1 %vm54_vm1, %v526_v10 }
  0x14   :  { %220 = vperm.xlu0 %431, %v27_v2   ;;  %215 = vperm.xlu1 %432, %v26_v6  }
  0x15   :  { %150 = vperm.xlu2 %433, %v147_v53  }
  0x1b   :  { %405 = vmatmul.msk.f32.gmra.mxu0 %vm54_vm1, %v535_v11  ;;  %410 = vmatmul.msk.f32.gmra.mxu1 %vm54_vm1, %v535_v11 }
  0x1c   :  { %331 = vperm.xlu0 %431, %v328_v12  }
  0x23   :  { %406 = vmatmul.msk.f32.gmra.mxu0 %vm54_vm1, %v547_v13  ;;  %411 = vmatmul.msk.f32.gmra.mxu1 %vm54_vm1, %v547_v13 }
  0x5e   :  { %v231_v54 = vpop.permute.xlu2 %230 }
  0x67   :  { %v226_v55 = vpop.permute.xlu2 %225 }
  0x6f   :  { %v151_v56 = vpop.permute.xlu2 %150 }
  0x74   :  { %v48_v18 = vpop.permute.xlu0 %47  ;;  %v38_v19 = vpop.permute.xlu1 %37 }
  0x7e   :  { %v43_v22 = vpop.permute.xlu0 %42  ;;  %v33_v23 = vpop.permute.xlu1 %32 }
  0x88   :  { %v89_v14 = vpop.f32.mrf.mxu0  ;;  %v118_v15 = vpop.f32.mrf.mxu1 }
  0x89   :  { %v90_v32 = vadd.f32 %v89_v14, %v33_v23  ;;  %v119_v33 = vadd.f32 %v118_v15, %v33_v23 }
  0x8b   :  { %v130_v42 = vmax.f32 %v90_v32, 0.0  ;;  %v131_v43 = vmax.f32 %v119_v33, 0.0  ;;  %v327_v33 = vld [vmem:[%s592_s3] sm:$0xf]  ;;  %s462_s3 = smov 128  }
  0x8d   :  { %v138_v48 = vmin.f32 %v130_v42, 6.0  ;;  %v139_v49 = vmin.f32 %v131_v43, 6.0 }
  0x90   :  { %v92_v16 = vpop.f32.mrf.mxu0  ;;  %v121_v17 = vpop.f32.mrf.mxu1 }
  0x91   :  { %v93_v28 = vadd.f32 %v92_v16, %v38_v19  ;;  %v122_v29 = vadd.f32 %v121_v17, %v38_v19 }
  0x93   :  { %v132_v38 = vmax.f32 %v93_v28, 0.0  ;;  %v133_v39 = vmax.f32 %v122_v29, 0.0 }
  0x95   :  { %v140_v46 = vmin.f32 %v132_v38, 6.0  ;;  %v141_v47 = vmin.f32 %v133_v39, 6.0 }
  0x98   :  { %v95_v20 = vpop.f32.mrf.mxu0  ;;  %v124_v21 = vpop.f32.mrf.mxu1 }
  0x99   :  { %v96_v24 = vadd.f32 %v95_v20, %v43_v22  ;;  %v125_v25 = vadd.f32 %v124_v21, %v43_v22 }
  0x9b   :  { %v134_v34 = vmax.f32 %v96_v24, 0.0  ;;  %v135_v35 = vmax.f32 %v125_v25, 0.0 }
  0x9d   :  { %v142_v44 = vmin.f32 %v134_v34, 6.0  ;;  %v143_v45 = vmin.f32 %v135_v35, 6.0 }
  0xa0   :  { %v98_v26 = vpop.f32.mrf.mxu0  ;;  %v127_v27 = vpop.f32.mrf.mxu1 }
  0xa1   :  { %v99_v30 = vadd.f32 %v98_v26, %v48_v18  ;;  %v128_v31 = vadd.f32 %v127_v27, %v48_v18 }
  0xa3   :  { %v136_v36 = vmax.f32 %v99_v30, 0.0  ;;  %v137_v37 = vmax.f32 %v128_v31, 0.0 }
  0xa5   :  { %v144_v40 = vmin.f32 %v136_v36, 6.0  ;;  %v145_v41 = vmin.f32 %v137_v37, 6.0 }
  0xa7   :  { %169 = vmatpush.msra.mxu2 %v144_v40  ;;  %189 = vmatpush.msra.mxu3 %v145_v41 }
  0xa9   :  { %170 = vmatpush.msra.mxu2 %v142_v44  ;;  %190 = vmatpush.msra.mxu3 %v143_v45 }
  0xab   :  { %171 = vmatpush.msra.mxu2 %v140_v46  ;;  %191 = vmatpush.msra.mxu3 %v141_v47 }
  0xad   :  { %172 = vmatpush.msra.mxu2 %v138_v48  ;;  %192 = vmatpush.msra.mxu3 %v139_v49 }
  0xae   :  { %412 = vmatmul.msk.f32.vlgmr.msra.gmra.mxu2 %vm153_vm2, %v146_v50  ;;  %413 = vmatmul.msk.f32.vlgmr.msra.gmra.mxu3 %vm153_vm2, %v146_v50 }
  0xaf   :  { %415 = vmatpush.msk.msrb.mxu2 %vm67_vm0, %v235_v51  ;;  %420 = vmatpush.msk.msrb.mxu3 %vm67_vm0, %v236_v52 }
  0xb6   :  { %416 = vmatmul.msk.f32.vlgmr.msrb.gmra.mxu2 %vm54_vm1, %v509_v5  ;;  %421 = vmatmul.msk.f32.vlgmr.msrb.gmra.mxu3 %vm54_vm1, %v509_v5  ;;  %v221_v5 = vpop.permute.xlu0 %220 }
  0xbe   :  { %417 = vmatmul.msk.f32.gmra.mxu2 %vm54_vm1, %v526_v10  ;;  %422 = vmatmul.msk.f32.gmra.mxu3 %vm54_vm1, %v526_v10  ;;  %v216_v10 = vpop.permute.xlu1 %215  ;;  %v332_v34 = vpop.permute.xlu0 %331 }
  0xc6   :  { %418 = vmatmul.msk.f32.gmra.mxu2 %vm54_vm1, %v535_v11  ;;  %423 = vmatmul.msk.f32.gmra.mxu3 %vm54_vm1, %v535_v11 }
  0xce   :  { %419 = vmatmul.msk.f32.gmra.mxu2 %vm54_vm1, %v547_v13  ;;  %424 = vmatmul.msk.f32.gmra.mxu3 %vm54_vm1, %v547_v13 }
 0x131   :  { %v174_v57 = vpop.f32.mrf.mxu2  ;;  %v194_v58 = vpop.f32.mrf.mxu3 }
 0x132   :  { %v175_v59 = vadd.f32 %v174_v57, %v151_v56  ;;  %v195_v60 = vadd.f32 %v194_v58, %v151_v56 }
 0x134   :  { %v199_v61 = vrot.slane %v195_v60, 4 }
 0x136   :  { %v200_v62 = vsel %vm67_vm0, %v175_v59, %v199_v61 }
 0x137   :  { %202 = vst [vmem:[#allocation2] sm:$0xff] %v200_v62 }
 0x139   :  { %v270_v63 = vpop.f32.mrf.mxu2  ;;  %v299_v0 = vpop.f32.mrf.mxu3 }
 0x13a   :  { %v271_v15 = vadd.f32 %v270_v63, %v216_v10  ;;  %v300_v16 = vadd.f32 %v299_v0, %v216_v10 }
 0x13c   :  { %v311_v25 = vmax.f32 %v271_v15, 0.0  ;;  %v312_v26 = vmax.f32 %v300_v16, 0.0 }
 0x13e   :  { %v319_v31 = vmin.f32 %v311_v25, 6.0  ;;  %v320_v32 = vmin.f32 %v312_v26, 6.0 }
 0x141   :  { %v273_v1 = vpop.f32.mrf.mxu2  ;;  %v302_v2 = vpop.f32.mrf.mxu3 }
 0x142   :  { %v274_v11 = vadd.f32 %v273_v1, %v221_v5  ;;  %v303_v12 = vadd.f32 %v302_v2, %v221_v5 }
 0x144   :  { %v313_v21 = vmax.f32 %v274_v11, 0.0  ;;  %v314_v22 = vmax.f32 %v303_v12, 0.0 }
 0x146   :  { %v321_v29 = vmin.f32 %v313_v21, 6.0  ;;  %v322_v30 = vmin.f32 %v314_v22, 6.0 }
 0x149   :  { %v276_v3 = vpop.f32.mrf.mxu2  ;;  %v305_v4 = vpop.f32.mrf.mxu3 }
 0x14a   :  { %v277_v6 = vadd.f32 %v276_v3, %v226_v55  ;;  %v306_v7 = vadd.f32 %v305_v4, %v226_v55 }
 0x14c   :  { %v315_v17 = vmax.f32 %v277_v6, 0.0  ;;  %v316_v18 = vmax.f32 %v306_v7, 0.0 }
 0x14e   :  { %v323_v27 = vmin.f32 %v315_v17, 6.0  ;;  %v324_v28 = vmin.f32 %v316_v18, 6.0 }
 0x151   :  { %v279_v8 = vpop.f32.mrf.mxu2  ;;  %v308_v9 = vpop.f32.mrf.mxu3 }
 0x152   :  { %v280_v13 = vadd.f32 %v279_v8, %v231_v54  ;;  %v309_v14 = vadd.f32 %v308_v9, %v231_v54 }
 0x154   :  { %v317_v19 = vmax.f32 %v280_v13, 0.0  ;;  %v318_v20 = vmax.f32 %v309_v14, 0.0 }
 0x156   :  { %v325_v23 = vmin.f32 %v317_v19, 6.0  ;;  %v326_v24 = vmin.f32 %v318_v20, 6.0 }
 0x158   :  { %349 = vmatpush.msrb.mxu0 %v325_v23  ;;  %369 = vmatpush.msrb.mxu1 %v326_v24 }
 0x15a   :  { %350 = vmatpush.msrb.mxu0 %v323_v27  ;;  %370 = vmatpush.msrb.mxu1 %v324_v28 }
 0x15c   :  { %351 = vmatpush.msrb.mxu0 %v321_v29  ;;  %371 = vmatpush.msrb.mxu1 %v322_v30 }
 0x15e   :  { %352 = vmatpush.msrb.mxu0 %v319_v31  ;;  %372 = vmatpush.msrb.mxu1 %v320_v32 }
 0x15f   :  { %425 = vmatmul.msk.f32.vlgmr.msrb.gmra.mxu0 %vm153_vm2, %v327_v33  ;;  %426 = vmatmul.msk.f32.vlgmr.msrb.gmra.mxu1 %vm153_vm2, %v327_v33 }
 0x1dc   :  { %v354_v35 = vpop.f32.mrf.mxu0  ;;  %v374_v36 = vpop.f32.mrf.mxu1 }
 0x1dd   :  { %v375_v37 = vadd.f32 %v374_v36, %v332_v34  ;;  %v355_v38 = vadd.f32 %v354_v35, %v332_v34 }
 0x1df   :  { %v379_v39 = vrot.slane %v375_v37, 4 }
 0x1e1   :  { %v380_v40 = vsel %vm67_vm0, %v355_v38, %v379_v39 }
 0x1e2   :  { %383 = vst [vmem:[#allocation2 + $0x8] sm:$0xff] %v380_v40 }
 0x1e3   :  { %396 = dma.vmem_to_hbm [thread:$0]  %s389_s18, 256, %s391_s21, [#allocation3], %s462_s3, %s462_s3, %s463_s22  }
 0x1e4   :  { %458 = dma.done.wait [#allocation3], 256  }
 0x1e5   :  { %459 = vsyncadd [#allocation3], 4294967040 }
 0x1e6   :  { %401 = vsyncpa [#allocation3], 1 }

// kernel: tpu_custom_call.1
= control target key start
LH: loop header
LB: loop body
LE: loop exit
PB: predicated region body
PF: predicated region fallthrough
CT: control target
= control target key end

     0   :  { %v460_v1 = vmov 0   ;;  %s589_s0 = inlined_call_operand.vmem [shape: f32[2,4,256], index: 0, kind: input, shape index: {}]   ;;  %s590_s1 = inlined_call_operand.vmem [shape: f32[32,4], index: 1, kind: input, shape index: {}]   ;;  %s591_s2 = inlined_call_operand.vmem [shape: f32[32,1], index: 2, kind: input, shape index: {}]   ;;  %s592_s3 = inlined_call_operand.vmem [shape: f32[4,32], index: 3, kind: input, shape index: {}]   ;;  %s593_s4 = inlined_call_operand.vmem [shape: f32[4,1], index: 4, kind: input, shape index: {}]   ;;  %s594_s5 = inlined_call_operand.hbm [shape: f32[2,4,256], index: 5, kind: output, shape index: {}]  }
   0x1   :  { %v21_v0 = vld [vmem:[%s589_s0] sm:$0xff]  ;;  %432 = vset.pattern.permute.xlu1 %v460_v1  ;;  %v27_v2 = vld [vmem:[%s591_s2 + $0x8] sm:$0xff]  ;;  %431 = vset.pattern.permute.xlu0 %v460_v1  ;;  %v29_v3 = vld [vmem:[%s591_s2 + $0x18] sm:$0xff] }
   0x2   :  { %51 = vst [vmem:[#allocation1] ss:$2 sm:$0xff] %v21_v0  ;;  %37 = vperm.xlu1 %432, %v27_v2   ;;  %47 = vperm.xlu0 %431, %v29_v3  }
   0x3   :  { %433 = vset.pattern.permute.xlu2 %v460_v1 }
   0x4   :  { %10 = vsyncpa [#allocation3], 0  ;;  %230 = vperm.xlu2 %433, %v29_v3   ;;  %vm67_vm0 = vcmask 1043456   ;;  %v414_v4 = vld [vmem:[%s589_s0 + $0x8] sm:$0xff]  ;;  %v509_v5 = vld [vmem:[%s590_s1] sm:$0xff]  ;;  %vm54_vm1 = vcmask 31744  }
   0x5   :  { %v26_v6 = vld [vmem:[%s591_s2] sm:$0xff]  ;;  %v28_v7 = vld [vmem:[%s591_s2 + $0x10] sm:$0xff]  ;;  %v526_v10 = vld [vmem:[%s590_s1 + $0x8] sm:$0xff]  ;;  %vm153_vm2 = vcmask 261120   ;;  %s461_s17 = smov [#allocation2]   ;;  %s390_s21 = sshll.u32 %s594_s5, 4  ;;  %s391_s21 = int_to_ptr.hbm [resolvable:$true] %s390_s21 }
   0x6   :  { %v535_v11 = vld [vmem:[%s590_s1 + $0x10] sm:$0xff]  ;;  %v328_v12 = vld [vmem:[%s593_s4] sm:$0xf]  ;;  %v547_v13 = vld [vmem:[%s590_s1 + $0x18] sm:$0xff]  ;;  %s388_s18 = sshll.u32 %s461_s17, 4  ;;  %s463_s22 = smov 8   ;;  %s389_s18 = int_to_ptr.vmem [resolvable:$true] %s388_s18 }
   0x7   :  { %v146_v50 = vld [vmem:[%s592_s3] sm:$0xf] }
   0x8   :  { %v147_v53 = vld [vmem:[%s593_s4] sm:$0xf] }
   0x9   :  { %v52_v8 = vld.sshfl [vmem:[#allocation1] sm:$0xff pattern:$0x75316420]  ;;  %v53_v9 = vld.sshfl [vmem:[#allocation1 + $0x8] sm:$0xff pattern:$0x75316420] }
   0xa   :  { %402 = vmatpush.msk.msra.mxu0 %vm67_vm0, %v52_v8  ;;  %407 = vmatpush.msk.msra.mxu1 %vm67_vm0, %v53_v9  ;;  %234 = vst [vmem:[#allocation1] ss:$2 sm:$0xff] %v414_v4 }
   0xb   :  { %403 = vmatmul.msk.f32.vlgmr.msra.gmra.mxu0 %vm54_vm1, %v509_v5  ;;  %408 = vmatmul.msk.f32.vlgmr.msra.gmra.mxu1 %vm54_vm1, %v509_v5 }
   0xc   :  { %32 = vperm.xlu1 %432, %v26_v6   ;;  %42 = vperm.xlu0 %431, %v28_v7  }
   0xd   :  { %225 = vperm.xlu2 %433, %v28_v7  }
  0x11   :  { %v235_v51 = vld.sshfl [vmem:[#allocation1] sm:$0xff pattern:$0x75316420]  ;;  %v236_v52 = vld.sshfl [vmem:[#allocation1 + $0x8] sm:$0xff pattern:$0x75316420] }
  0x13   :  { %404 = vmatmul.msk.f32.gmra.mxu0 %vm54_vm1, %v526_v10  ;;  %409 = vmatmul.msk.f32.gmra.mxu1 %vm54_vm1, %v526_v10 }
  0x14   :  { %220 = vperm.xlu0 %431, %v27_v2   ;;  %215 = vperm.xlu1 %432, %v26_v6  }
  0x15   :  { %150 = vperm.xlu2 %433, %v147_v53  }
  0x1b   :  { %405 = vmatmul.msk.f32.gmra.mxu0 %vm54_vm1, %v535_v11  ;;  %410 = vmatmul.msk.f32.gmra.mxu1 %vm54_vm1, %v535_v11 }
  0x1c   :  { %331 = vperm.xlu0 %431, %v328_v12  }
  0x23   :  { %406 = vmatmul.msk.f32.gmra.mxu0 %vm54_vm1, %v547_v13  ;;  %411 = vmatmul.msk.f32.gmra.mxu1 %vm54_vm1, %v547_v13 }
  0x5e   :  { %v231_v54 = vpop.permute.xlu2 %230 }
  0x67   :  { %v226_v55 = vpop.permute.xlu2 %225 }
  0x6f   :  { %v151_v56 = vpop.permute.xlu2 %150 }
  0x74   :  { %v48_v18 = vpop.permute.xlu0 %47  ;;  %v38_v19 = vpop.permute.xlu1 %37 }
  0x7e   :  { %v43_v22 = vpop.permute.xlu0 %42  ;;  %v33_v23 = vpop.permute.xlu1 %32 }
  0x88   :  { %v89_v14 = vpop.f32.mrf.mxu0  ;;  %v118_v15 = vpop.f32.mrf.mxu1 }
  0x89   :  { %v90_v32 = vadd.f32 %v89_v14, %v33_v23  ;;  %v119_v33 = vadd.f32 %v118_v15, %v33_v23 }
  0x8b   :  { %v130_v42 = vmax.f32 %v90_v32, 0.0  ;;  %v131_v43 = vmax.f32 %v119_v33, 0.0  ;;  %v327_v33 = vld [vmem:[%s592_s3] sm:$0xf]  ;;  %s462_s3 = smov 128  }
  0x8d   :  { %v138_v48 = vmin.f32 %v130_v42, 6.0  ;;  %v139_v49 = vmin.f32 %v131_v43, 6.0 }
  0x90   :  { %v92_v16 = vpop.f32.mrf.mxu0  ;;  %v121_v17 = vpop.f32.mrf.mxu1 }
  0x91   :  { %v93_v28 = vadd.f32 %v92_v16, %v38_v19  ;;  %v122_v29 = vadd.f32 %v121_v17, %v38_v19 }
  0x93   :  { %v132_v38 = vmax.f32 %v93_v28, 0.0  ;;  %v133_v39 = vmax.f32 %v122_v29, 0.0 }
  0x95   :  { %v140_v46 = vmin.f32 %v132_v38, 6.0  ;;  %v141_v47 = vmin.f32 %v133_v39, 6.0 }
  0x98   :  { %v95_v20 = vpop.f32.mrf.mxu0  ;;  %v124_v21 = vpop.f32.mrf.mxu1 }
  0x99   :  { %v96_v24 = vadd.f32 %v95_v20, %v43_v22  ;;  %v125_v25 = vadd.f32 %v124_v21, %v43_v22 }
  0x9b   :  { %v134_v34 = vmax.f32 %v96_v24, 0.0  ;;  %v135_v35 = vmax.f32 %v125_v25, 0.0 }
  0x9d   :  { %v142_v44 = vmin.f32 %v134_v34, 6.0  ;;  %v143_v45 = vmin.f32 %v135_v35, 6.0 }
  0xa0   :  { %v98_v26 = vpop.f32.mrf.mxu0  ;;  %v127_v27 = vpop.f32.mrf.mxu1 }
  0xa1   :  { %v99_v30 = vadd.f32 %v98_v26, %v48_v18  ;;  %v128_v31 = vadd.f32 %v127_v27, %v48_v18 }
  0xa3   :  { %v136_v36 = vmax.f32 %v99_v30, 0.0  ;;  %v137_v37 = vmax.f32 %v128_v31, 0.0 }
  0xa5   :  { %v144_v40 = vmin.f32 %v136_v36, 6.0  ;;  %v145_v41 = vmin.f32 %v137_v37, 6.0 }
  0xa7   :  { %169 = vmatpush.msra.mxu2 %v144_v40  ;;  %189 = vmatpush.msra.mxu3 %v145_v41 }
  0xa9   :  { %170 = vmatpush.msra.mxu2 %v142_v44  ;;  %190 = vmatpush.msra.mxu3 %v143_v45 }
  0xab   :  { %171 = vmatpush.msra.mxu2 %v140_v46  ;;  %191 = vmatpush.msra.mxu3 %v141_v47 }
  0xad   :  { %172 = vmatpush.msra.mxu2 %v138_v48  ;;  %192 = vmatpush.msra.mxu3 %v139_v49 }
  0xae   :  { %412 = vmatmul.msk.f32.vlgmr.msra.gmra.mxu2 %vm153_vm2, %v146_v50  ;;  %413 = vmatmul.msk.f32.vlgmr.msra.gmra.mxu3 %vm153_vm2, %v146_v50 }
  0xaf   :  { %415 = vmatpush.msk.msrb.mxu2 %vm67_vm0, %v235_v51  ;;  %420 = vmatpush.msk.msrb.mxu3 %vm67_vm0, %v236_v52 }
  0xb6   :  { %416 = vmatmul.msk.f32.vlgmr.msrb.gmra.mxu2 %vm54_vm1, %v509_v5  ;;  %421 = vmatmul.msk.f32.vlgmr.msrb.gmra.mxu3 %vm54_vm1, %v509_v5  ;;  %v221_v5 = vpop.permute.xlu0 %220 }
  0xbe   :  { %417 = vmatmul.msk.f32.gmra.mxu2 %vm54_vm1, %v526_v10  ;;  %422 = vmatmul.msk.f32.gmra.mxu3 %vm54_vm1, %v526_v10  ;;  %v216_v10 = vpop.permute.xlu1 %215  ;;  %v332_v34 = vpop.permute.xlu0 %331 }
  0xc6   :  { %418 = vmatmul.msk.f32.gmra.mxu2 %vm54_vm1, %v535_v11  ;;  %423 = vmatmul.msk.f32.gmra.mxu3 %vm54_vm1, %v535_v11 }
  0xce   :  { %419 = vmatmul.msk.f32.gmra.mxu2 %vm54_vm1, %v547_v13  ;;  %424 = vmatmul.msk.f32.gmra.mxu3 %vm54_vm1, %v547_v13 }
 0x131   :  { %v174_v57 = vpop.f32.mrf.mxu2  ;;  %v194_v58 = vpop.f32.mrf.mxu3 }
 0x132   :  { %v175_v59 = vadd.f32 %v174_v57, %v151_v56  ;;  %v195_v60 = vadd.f32 %v194_v58, %v151_v56 }
 0x134   :  { %v199_v61 = vrot.slane %v195_v60, 4 }
 0x136   :  { %v200_v62 = vsel %vm67_vm0, %v175_v59, %v199_v61 }
 0x137   :  { %202 = vst [vmem:[#allocation2] sm:$0xff] %v200_v62 }
 0x139   :  { %v270_v63 = vpop.f32.mrf.mxu2  ;;  %v299_v0 = vpop.f32.mrf.mxu3 }
 0x13a   :  { %v271_v15 = vadd.f32 %v270_v63, %v216_v10  ;;  %v300_v16 = vadd.f32 %v299_v0, %v216_v10 }
 0x13c   :  { %v311_v25 = vmax.f32 %v271_v15, 0.0  ;;  %v312_v26 = vmax.f32 %v300_v16, 0.0 }
 0x13e   :  { %v319_v31 = vmin.f32 %v311_v25, 6.0  ;;  %v320_v32 = vmin.f32 %v312_v26, 6.0 }
 0x141   :  { %v273_v1 = vpop.f32.mrf.mxu2  ;;  %v302_v2 = vpop.f32.mrf.mxu3 }
 0x142   :  { %v274_v11 = vadd.f32 %v273_v1, %v221_v5  ;;  %v303_v12 = vadd.f32 %v302_v2, %v221_v5 }
 0x144   :  { %v313_v21 = vmax.f32 %v274_v11, 0.0  ;;  %v314_v22 = vmax.f32 %v303_v12, 0.0 }
 0x146   :  { %v321_v29 = vmin.f32 %v313_v21, 6.0  ;;  %v322_v30 = vmin.f32 %v314_v22, 6.0 }
 0x149   :  { %v276_v3 = vpop.f32.mrf.mxu2  ;;  %v305_v4 = vpop.f32.mrf.mxu3 }
 0x14a   :  { %v277_v6 = vadd.f32 %v276_v3, %v226_v55  ;;  %v306_v7 = vadd.f32 %v305_v4, %v226_v55 }
 0x14c   :  { %v315_v17 = vmax.f32 %v277_v6, 0.0  ;;  %v316_v18 = vmax.f32 %v306_v7, 0.0 }
 0x14e   :  { %v323_v27 = vmin.f32 %v315_v17, 6.0  ;;  %v324_v28 = vmin.f32 %v316_v18, 6.0 }
 0x151   :  { %v279_v8 = vpop.f32.mrf.mxu2  ;;  %v308_v9 = vpop.f32.mrf.mxu3 }
 0x152   :  { %v280_v13 = vadd.f32 %v279_v8, %v231_v54  ;;  %v309_v14 = vadd.f32 %v308_v9, %v231_v54 }
 0x154   :  { %v317_v19 = vmax.f32 %v280_v13, 0.0  ;;  %v318_v20 = vmax.f32 %v309_v14, 0.0 }
 0x156   :  { %v325_v23 = vmin.f32 %v317_v19, 6.0  ;;  %v326_v24 = vmin.f32 %v318_v20, 6.0 }
 0x158   :  { %349 = vmatpush.msrb.mxu0 %v325_v23  ;;  %369 = vmatpush.msrb.mxu1 %v326_v24 }
 0x15a   :  { %350 = vmatpush.msrb.mxu0 %v323_v27  ;;  %370 = vmatpush.msrb.mxu1 %v324_v28 }
 0x15c   :  { %351 = vmatpush.msrb.mxu0 %v321_v29  ;;  %371 = vmatpush.msrb.mxu1 %v322_v30 }
 0x15e   :  { %352 = vmatpush.msrb.mxu0 %v319_v31  ;;  %372 = vmatpush.msrb.mxu1 %v320_v32 }
 0x15f   :  { %425 = vmatmul.msk.f32.vlgmr.msrb.gmra.mxu0 %vm153_vm2, %v327_v33  ;;  %426 = vmatmul.msk.f32.vlgmr.msrb.gmra.mxu1 %vm153_vm2, %v327_v33 }
 0x1dc   :  { %v354_v35 = vpop.f32.mrf.mxu0  ;;  %v374_v36 = vpop.f32.mrf.mxu1 }
 0x1dd   :  { %v375_v37 = vadd.f32 %v374_v36, %v332_v34  ;;  %v355_v38 = vadd.f32 %v354_v35, %v332_v34 }
 0x1df   :  { %v379_v39 = vrot.slane %v375_v37, 4 }
 0x1e1   :  { %v380_v40 = vsel %vm67_vm0, %v355_v38, %v379_v39 }
 0x1e2   :  { %383 = vst [vmem:[#allocation2 + $0x8] sm:$0xff] %v380_v40 }
 0x1e3   :  { %396 = dma.vmem_to_hbm [thread:$0]  %s389_s18, 256, %s391_s21, [#allocation3], %s462_s3, %s462_s3, %s463_s22  }
 0x1e4   :  { %458 = dma.done.wait [#allocation3], 256  }
 0x1e5   :  { %459 = vsyncadd [#allocation3], 4294967040 }
 0x1e6   :  { %401 = vsyncpa [#allocation3], 1 }

</bundles_post_ra>
